<compile_context>
chip_gen: v7x
topology: tpu7x:2x2x1
jax: 0.10.0
libtpu: 0.0.40
codegen_flags: <defaults>
</compile_context>

<pallas_src>
import jax
import jax.numpy as jnp
from jax.experimental import pallas as pl
from jax.experimental.pallas import tpu as pltpu


_HALF_LOG_2PI = 0.9189385332046727  # 0.5 * log(2*pi)


# ----------------------------------------------------------------------------
# lgamma: shifted Stirling series, float32-safe for the whole count range.
#
#   lgamma(x) = lgamma(x + 6) - log(x (x+1)(x+2)(x+3)(x+4)(x+5))
#   lgamma(z) ~= (z - 0.5) log z - z + 0.5 log(2 pi) + 1/(12 z) - 1/(360 z^3)
#
# The degree-6 shift product is evaluated by symmetric pairing
#   a = x (x+5);   x(x+5) * (x+1)(x+4) * (x+2)(x+3) = a (a+4) (a+6)
# and split across two logs so no intermediate exceeds ~x^4 (no f32 overflow
# for any realistic argument; truncation error < 2e-7 absolute for x > 0).
# EUP cost: 3 logs + 1 approx reciprocal.  VALU cost: ~15 ops.
# ----------------------------------------------------------------------------
def _lgamma(x):
    z = x + 6.0
    r = pl.reciprocal(z, approx=True)      # EUP slot; ~2^-12 rel. err is ample
    stirling = ((z - 0.5) * jnp.log(z) - z + _HALF_LOG_2PI
                + r * (1.0 / 12.0 - (r * r) * (1.0 / 360.0)))
    a = x * (x + 5.0)
    corr = jnp.log(a * (a + 4.0)) + jnp.log(a + 6.0)
    return stirling - corr


def _nb_tile(mu, theta, y, eps):
    """Per-element NB negative log-likelihood for one (bm, d) f32 tile."""
    t = theta + eps                        # theta + eps
    ty = theta + y                         # theta + y
    s = t + y                              # y + theta + eps
    u = y + 1.0
    t1 = _lgamma(t) + _lgamma(u) - _lgamma(s)
    # log(1 + mu/(theta+eps)) == log(theta+eps+mu) - log(theta+eps)
    log_t = jnp.log(t)
    log_tmu = jnp.log(t + mu)
    log_mu = jnp.log(mu + eps)
    t2 = ty * (log_tmu - log_t) + y * (log_t - log_mu)
    final = t1 + t2
    return jnp.where(jnp.isnan(final), jnp.inf, final)   # _nan2inf


# ----------------------------------------------------------------------------
# Kernel
# ----------------------------------------------------------------------------
def _make_kernel(*, n_rows, d, bm, blocks_per_split, num_blocks, splits, eps,
                 fused_yhat):
    needs_mask = (n_rows % bm) != 0                     # only the last block is ragged
    may_overcover = splits * blocks_per_split > num_blocks
    groups = bm // 8

    def fold(x):
        # (bm, d) -> (8, d): sublane-group partial sums (pure VALU adds).
        return jnp.sum(x.reshape(groups, 8, d), axis=0)

    def kernel(*refs):
        if fused_yhat:
            yhat_ref, y_ref, out_ref, acc_ref = refs
        else:
            mu_ref, theta_ref, y_ref, out_ref, acc_ref = refs

        c = pl.program_id(0)          # core-parallel split
        i = pl.program_id(1)          # reduction axis ("arbitrary")
        blk = c * blocks_per_split + i
        row0 = blk * bm

        @pl.when(i == 0)
        def _init():
            acc_ref[...] = jnp.zeros((8, d), jnp.float32)

        def tile_body():
            if fused_yhat:
                # Lane-aligned (d % 128 == 0) slices of the fused block: free.
                mu = yhat_ref[:, :d].astype(jnp.float32)
                theta = yhat_ref[:, d:].astype(jnp.float32)
            else:
                mu = mu_ref[...].astype(jnp.float32)
                theta = theta_ref[...].astype(jnp.float32)
            y = y_ref[...].astype(jnp.float32)

            final = _nb_tile(mu, theta, y, eps)

            if needs_mask:
                # Only the very last row-block can be ragged; every interior
                # block skips the iota/compare/select entirely.
                is_partial = blk == (num_blocks - 1)

                @pl.when(is_partial)
                def _acc_masked():
                    rows = row0 + jax.lax.broadcasted_iota(
                        jnp.int32, final.shape, 0)
                    acc_ref[...] += fold(jnp.where(rows < n_rows, final, 0.0))

                @pl.when(jnp.logical_not(is_partial))
                def _acc_full():
                    acc_ref[...] += fold(final)
            else:
                acc_ref[...] += fold(final)

        if may_overcover:
            # Ragged split: clamped duplicate trailing blocks do no compute.
            pl.when(row0 < n_rows)(tile_body)
        else:
            tile_body()

        @pl.when(i == blocks_per_split - 1)
        def _finalize():
            out_ref[...] = jnp.broadcast_to(jnp.sum(acc_ref[...]),
                                            out_ref.shape)

    return kernel


# ----------------------------------------------------------------------------
# Wrapper
# ----------------------------------------------------------------------------
def _round_up(x, m):
    return ((x + m - 1) // m) * m


def _default_core_splits():
    # 2-way split lets both v7x TensorCores participate; on single-TC chips
    # the out-of-range duplicate tiles are skipped in-kernel so the overhead
    # is just one extra init/finalize.
    try:
        info = pltpu.get_tpu_info()
        for name in ("num_tensorcores", "tensorcore_count", "num_cores",
                     "core_count", "cores_per_chip"):
            v = getattr(info, name, None)
            if v:
                return max(1, int(v))
    except Exception:
        pass
    return 2


def nb_loss(yhat, y, eps=1e-8, block_rows=None, core_splits=None):
    n, two_d = yhat.shape
    d = two_d // 2
    assert y.shape == (n, d), (yhat.shape, y.shape)

    # Row-tile size: ~2 MiB per (bm, d) f32 operand tile, <= 2048 rows,
    # multiple of 8.  Double-buffered inputs + elementwise temporaries stay
    # within the 56 MiB scoped-VMEM limit below (fits v7x's 64 MiB physical).
    if block_rows is None:
        block_rows = min(2048, max(8, (2 << 20) // (4 * d)))
    bm = max(8, min(_round_up(block_rows, 8), _round_up(n, 8)))

    num_blocks = pl.cdiv(n, bm)
    if core_splits is None:
        core_splits = _default_core_splits()
    splits = max(1, min(int(core_splits), num_blocks))
    blocks_per_split = pl.cdiv(num_blocks, splits)
    last_block = num_blocks - 1

    def row_block(c, i):
        # Clamp so over-covered trailing blocks DMA a valid (duplicate) tile;
        # the kernel skips their compute entirely.
        return jnp.minimum(c * blocks_per_split + i, last_block)

    fused = (d % 128 == 0)
    if fused:
        # One contiguous (bm, 2d) DMA per tile; mu/theta split in-kernel.
        inputs = (yhat, y)
        in_specs = [
            pl.BlockSpec((bm, 2 * d), lambda c, i: (row_block(c, i), 0)),
            pl.BlockSpec((bm, d), lambda c, i: (row_block(c, i), 0)),
        ]
    else:
        # Lane-unaligned D: split mu/theta once in the wrapper.
        # TODO(synk): avoid this extra HBM round trip with element-offset
        # manual DMA (memory_space=pl.ANY) or by padding D to a lane multiple.
        inputs = (yhat[:, :d], yhat[:, d:two_d], y)
        spec = pl.BlockSpec((bm, d), lambda c, i: (row_block(c, i), 0))
        in_specs = [spec, spec, spec]

    kernel = _make_kernel(n_rows=n, d=d, bm=bm,
                          blocks_per_split=blocks_per_split,
                          num_blocks=num_blocks, splits=splits,
                          eps=float(eps), fused_yhat=fused)

    out = pl.pallas_call(
        kernel,
        out_shape=jax.ShapeDtypeStruct((splits, 8, 128), jnp.float32),
        grid_spec=pltpu.PrefetchScalarGridSpec(
            num_scalar_prefetch=0,
            grid=(splits, blocks_per_split),
            in_specs=in_specs,
            out_specs=pl.BlockSpec((1, 8, 128), lambda c, i: (c, 0, 0)),
            scratch_shapes=[pltpu.VMEM((8, d), jnp.float32)],
        ),
        compiler_params=pltpu.CompilerParams(
            dimension_semantics=("parallel", "arbitrary"),
            vmem_limit_bytes=56 * 1024 * 1024,
        ),
    )(*inputs)

    # Per-split partial sums (replicated within each (8,128) block) -> mean.
    return jnp.sum(out[:, 0, 0]) / float(n * d)


def nb_loss_ref(yhat, y, eps=1e-8):
    """Pure-JAX reference matching the PyTorch forward."""
    d = yhat.shape[1] // 2
    mu = yhat[:, :d].astype(jnp.float32)
    theta = yhat[:, d:].astype(jnp.float32)
    y = y.astype(jnp.float32)
    lg = jax.scipy.special.gammaln
    t1 = lg(theta + eps) + lg(y + 1.0) - lg(y + theta + eps)
    t2 = (theta + y) * jnp.log(1.0 + mu / (theta + eps)) + y * (
        jnp.log(theta + eps) - jnp.log(mu + eps)
    )
    final = t1 + t2
    final = jnp.where(jnp.isnan(final), jnp.inf, final)
    return jnp.mean(final)


if __name__ == "__main__":
    def make_inputs(key, n, dd, mu_max=5.0, theta_max=3.0, y_max=10.0):
        k_mu, k_th, k_y = jax.random.split(key, 3)
        mu = jax.random.uniform(k_mu, (n, dd), jnp.float32, minval=0.1,
                                maxval=mu_max)
        theta = jax.random.uniform(k_th, (n, dd), jnp.float32, minval=0.5,
                                   maxval=theta_max)
        yhat = jnp.concatenate([mu, theta], axis=1)          # (n, 2*dd)
        y = jnp.floor(jax.random.uniform(k_y, (n, dd), jnp.float32,
                                         minval=0.0, maxval=y_max))
        return yhat, y

    root = jax.random.PRNGKey(0)
    k1, k2, k3, k4 = jax.random.split(root, 4)

    # Case 1: lane-aligned D -> fused yhat block + in-kernel aligned slices.
    yhat1, y1 = make_inputs(k1, 16, 128)
    loss1 = nb_loss(yhat1, y1)
    jax.block_until_ready(loss1)
    ref1 = nb_loss_ref(yhat1, y1)
    assert jnp.allclose(loss1, ref1, rtol=1e-3, atol=1e-3), (loss1, ref1)

    # Case 2: ragged rows + non-128 D -> wrapper split + row-mask path.
    yhat2, y2 = make_inputs(k2, 19, 96)
    loss2 = nb_loss(yhat2, y2)
    jax.block_until_ready(loss2)
    ref2 = nb_loss_ref(yhat2, y2)
    assert jnp.allclose(loss2, ref2, rtol=1e-3, atol=1e-3), (loss2, ref2)

    # Case 3: multi-block, 2-way core split, ragged tail -> exercises the
    # skipped duplicate block + masked last block + fused slicing together.
    yhat3, y3 = make_inputs(k3, 200, 128)
    loss3 = nb_loss(yhat3, y3, block_rows=48, core_splits=2)
    jax.block_until_ready(loss3)
    ref3 = nb_loss_ref(yhat3, y3)
    assert jnp.allclose(loss3, ref3, rtol=1e-3, atol=1e-3), (loss3, ref3)

    # Case 4: large counts (y up to 1e6) -> verifies the Stirling lgamma has
    # no f32 overflow (the old rational-Lanczos form broke near y ~ 3e5).
    yhat4, y4 = make_inputs(k4, 64, 256, mu_max=1000.0, theta_max=100.0,
                            y_max=1.0e6)
    loss4 = nb_loss(yhat4, y4)
    jax.block_until_ready(loss4)
    ref4 = nb_loss_ref(yhat4, y4)
    assert jnp.isfinite(loss4), loss4
    assert jnp.allclose(loss4, ref4, rtol=5e-3, atol=1e-2), (loss4, ref4)

    print("KERNEL_OK")
</pallas_src>

<mosaic_0001>
module attributes {stable_mosaic.version = 11 : i64} {
  func.func @kernel(%arg0: i32, %arg1: i32, %arg2: memref<16x256xf32, #tpu.memory_space<vmem>>, %arg3: memref<16x128xf32, #tpu.memory_space<vmem>>, %arg4: memref<1x8x128xf32, #tpu.memory_space<vmem>>, %arg5: memref<8x128xf32, #tpu.memory_space<vmem>>) attributes {dimension_semantics = [#tpu.dimension_semantics<parallel>, #tpu.dimension_semantics<arbitrary>], iteration_bounds = array<i64: 1, 1>, scalar_prefetch = 0 : i64, scratch_operands = 1 : i64, tpu.core_type = #tpu.core_type<tc>, window_params = [{transform_indices = @transform_0, window_bounds = array<i64: 16, 256>}, {transform_indices = @transform_1, window_bounds = array<i64: 16, 128>}, {transform_indices = @transform_2, window_bounds = array<i64: 1, 8, 128>}]} {
    %c0_i32 = arith.constant 0 : i32
    %0 = arith.cmpi eq, %arg1, %c0_i32 : i32
    %1 = arith.extui %0 : i1 to i32
    %c0_i32_0 = arith.constant 0 : i32
    %2 = arith.cmpi ne, %1, %c0_i32_0 : i32
    scf.if %2 {
      %cst_39 = arith.constant 0.000000e+00 : f32
      %124 = vector.broadcast %cst_39 : f32 to vector<8x128xf32>
      %c0_40 = arith.constant 0 : index
      %c0_41 = arith.constant 0 : index
      %125 = vector.load %arg5[%c0_40, %c0_41] : memref<8x128xf32, #tpu.memory_space<vmem>>, vector<8x128xf32>
      tpu.vector_store %arg5[%c0_40, %c0_41], %124 {strides = array<i32>} : memref<8x128xf32, #tpu.memory_space<vmem>>, vector<8x128xf32>,
    } else {
    }
    %c0 = arith.constant 0 : index
    %c0_1 = arith.constant 0 : index
    %3 = vector.load %arg2[%c0, %c0_1] : memref<16x256xf32, #tpu.memory_space<vmem>>, vector<16x128xf32>
    %c0_2 = arith.constant 0 : index
    %c128 = arith.constant 128 : index
    %4 = vector.load %arg2[%c0_2, %c128] : memref<16x256xf32, #tpu.memory_space<vmem>>, vector<16x128xf32>
    %c0_3 = arith.constant 0 : index
    %c0_4 = arith.constant 0 : index
    %5 = vector.load %arg3[%c0_3, %c0_4] : memref<16x128xf32, #tpu.memory_space<vmem>>, vector<16x128xf32>
    %cst = arith.constant 9.99999993E-9 : f32
    %6 = vector.broadcast %cst : f32 to vector<16x128xf32>
    %7 = arith.addf %4, %6 : vector<16x128xf32>
    %8 = arith.addf %4, %5 : vector<16x128xf32>
    %9 = arith.addf %7, %5 : vector<16x128xf32>
    %cst_5 = arith.constant 1.000000e+00 : f32
    %10 = vector.broadcast %cst_5 : f32 to vector<16x128xf32>
    %11 = arith.addf %5, %10 : vector<16x128xf32>
    %cst_6 = arith.constant 6.000000e+00 : f32
    %12 = vector.broadcast %cst_6 : f32 to vector<16x128xf32>
    %13 = arith.addf %7, %12 : vector<16x128xf32>
    %14 = tpu.reciprocal %13 {approx = true} : vector<16x128xf32> -> vector<16x128xf32>
    %cst_7 = arith.constant 5.000000e-01 : f32
    %15 = vector.broadcast %cst_7 : f32 to vector<16x128xf32>
    %16 = arith.subf %13, %15 : vector<16x128xf32>
    %17 = math.log %13 : vector<16x128xf32>
    %18 = arith.mulf %16, %17 : vector<16x128xf32>
    %19 = arith.subf %18, %13 : vector<16x128xf32>
    %cst_8 = arith.constant 0.918938517 : f32
    %20 = vector.broadcast %cst_8 : f32 to vector<16x128xf32>
    %21 = arith.addf %19, %20 : vector<16x128xf32>
    %22 = arith.mulf %14, %14 : vector<16x128xf32>
    %cst_9 = arith.constant 0.00277777785 : f32
    %23 = vector.broadcast %cst_9 : f32 to vector<16x128xf32>
    %24 = arith.mulf %22, %23 : vector<16x128xf32>
    %cst_10 = arith.constant 0.0833333358 : f32
    %25 = vector.broadcast %cst_10 : f32 to vector<16x128xf32>
    %26 = arith.subf %25, %24 : vector<16x128xf32>
    %27 = arith.mulf %14, %26 : vector<16x128xf32>
    %28 = arith.addf %21, %27 : vector<16x128xf32>
    %cst_11 = arith.constant 5.000000e+00 : f32
    %29 = vector.broadcast %cst_11 : f32 to vector<16x128xf32>
    %30 = arith.addf %7, %29 : vector<16x128xf32>
    %31 = arith.mulf %7, %30 : vector<16x128xf32>
    %cst_12 = arith.constant 4.000000e+00 : f32
    %32 = vector.broadcast %cst_12 : f32 to vector<16x128xf32>
    %33 = arith.addf %31, %32 : vector<16x128xf32>
    %34 = arith.mulf %31, %33 : vector<16x128xf32>
    %35 = math.log %34 : vector<16x128xf32>
    %cst_13 = arith.constant 6.000000e+00 : f32
    %36 = vector.broadcast %cst_13 : f32 to vector<16x128xf32>
    %37 = arith.addf %31, %36 : vector<16x128xf32>
    %38 = math.log %37 : vector<16x128xf32>
    %39 = arith.addf %35, %38 : vector<16x128xf32>
    %40 = arith.subf %28, %39 : vector<16x128xf32>
    %cst_14 = arith.constant 6.000000e+00 : f32
    %41 = vector.broadcast %cst_14 : f32 to vector<16x128xf32>
    %42 = arith.addf %11, %41 : vector<16x128xf32>
    %43 = tpu.reciprocal %42 {approx = true} : vector<16x128xf32> -> vector<16x128xf32>
    %cst_15 = arith.constant 5.000000e-01 : f32
    %44 = vector.broadcast %cst_15 : f32 to vector<16x128xf32>
    %45 = arith.subf %42, %44 : vector<16x128xf32>
    %46 = math.log %42 : vector<16x128xf32>
    %47 = arith.mulf %45, %46 : vector<16x128xf32>
    %48 = arith.subf %47, %42 : vector<16x128xf32>
    %cst_16 = arith.constant 0.918938517 : f32
    %49 = vector.broadcast %cst_16 : f32 to vector<16x128xf32>
    %50 = arith.addf %48, %49 : vector<16x128xf32>
    %51 = arith.mulf %43, %43 : vector<16x128xf32>
    %cst_17 = arith.constant 0.00277777785 : f32
    %52 = vector.broadcast %cst_17 : f32 to vector<16x128xf32>
    %53 = arith.mulf %51, %52 : vector<16x128xf32>
    %cst_18 = arith.constant 0.0833333358 : f32
    %54 = vector.broadcast %cst_18 : f32 to vector<16x128xf32>
    %55 = arith.subf %54, %53 : vector<16x128xf32>
    %56 = arith.mulf %43, %55 : vector<16x128xf32>
    %57 = arith.addf %50, %56 : vector<16x128xf32>
    %cst_19 = arith.constant 5.000000e+00 : f32
    %58 = vector.broadcast %cst_19 : f32 to vector<16x128xf32>
    %59 = arith.addf %11, %58 : vector<16x128xf32>
    %60 = arith.mulf %11, %59 : vector<16x128xf32>
    %cst_20 = arith.constant 4.000000e+00 : f32
    %61 = vector.broadcast %cst_20 : f32 to vector<16x128xf32>
    %62 = arith.addf %60, %61 : vector<16x128xf32>
    %63 = arith.mulf %60, %62 : vector<16x128xf32>
    %64 = math.log %63 : vector<16x128xf32>
    %cst_21 = arith.constant 6.000000e+00 : f32
    %65 = vector.broadcast %cst_21 : f32 to vector<16x128xf32>
    %66 = arith.addf %60, %65 : vector<16x128xf32>
    %67 = math.log %66 : vector<16x128xf32>
    %68 = arith.addf %64, %67 : vector<16x128xf32>
    %69 = arith.subf %57, %68 : vector<16x128xf32>
    %70 = arith.addf %40, %69 : vector<16x128xf32>
    %cst_22 = arith.constant 6.000000e+00 : f32
    %71 = vector.broadcast %cst_22 : f32 to vector<16x128xf32>
    %72 = arith.addf %9, %71 : vector<16x128xf32>
    %73 = tpu.reciprocal %72 {approx = true} : vector<16x128xf32> -> vector<16x128xf32>
    %cst_23 = arith.constant 5.000000e-01 : f32
    %74 = vector.broadcast %cst_23 : f32 to vector<16x128xf32>
    %75 = arith.subf %72, %74 : vector<16x128xf32>
    %76 = math.log %72 : vector<16x128xf32>
    %77 = arith.mulf %75, %76 : vector<16x128xf32>
    %78 = arith.subf %77, %72 : vector<16x128xf32>
    %cst_24 = arith.constant 0.918938517 : f32
    %79 = vector.broadcast %cst_24 : f32 to vector<16x128xf32>
    %80 = arith.addf %78, %79 : vector<16x128xf32>
    %81 = arith.mulf %73, %73 : vector<16x128xf32>
    %cst_25 = arith.constant 0.00277777785 : f32
    %82 = vector.broadcast %cst_25 : f32 to vector<16x128xf32>
    %83 = arith.mulf %81, %82 : vector<16x128xf32>
    %cst_26 = arith.constant 0.0833333358 : f32
    %84 = vector.broadcast %cst_26 : f32 to vector<16x128xf32>
    %85 = arith.subf %84, %83 : vector<16x128xf32>
    %86 = arith.mulf %73, %85 : vector<16x128xf32>
    %87 = arith.addf %80, %86 : vector<16x128xf32>
    %cst_27 = arith.constant 5.000000e+00 : f32
    %88 = vector.broadcast %cst_27 : f32 to vector<16x128xf32>
    %89 = arith.addf %9, %88 : vector<16x128xf32>
    %90 = arith.mulf %9, %89 : vector<16x128xf32>
    %cst_28 = arith.constant 4.000000e+00 : f32
    %91 = vector.broadcast %cst_28 : f32 to vector<16x128xf32>
    %92 = arith.addf %90, %91 : vector<16x128xf32>
    %93 = arith.mulf %90, %92 : vector<16x128xf32>
    %94 = math.log %93 : vector<16x128xf32>
    %cst_29 = arith.constant 6.000000e+00 : f32
    %95 = vector.broadcast %cst_29 : f32 to vector<16x128xf32>
    %96 = arith.addf %90, %95 : vector<16x128xf32>
    %97 = math.log %96 : vector<16x128xf32>
    %98 = arith.addf %94, %97 : vector<16x128xf32>
    %99 = arith.subf %87, %98 : vector<16x128xf32>
    %100 = arith.subf %70, %99 : vector<16x128xf32>
    %101 = math.log %7 : vector<16x128xf32>
    %102 = arith.addf %7, %3 : vector<16x128xf32>
    %103 = math.log %102 : vector<16x128xf32>
    %cst_30 = arith.constant 9.99999993E-9 : f32
    %104 = vector.broadcast %cst_30 : f32 to vector<16x128xf32>
    %105 = arith.addf %3, %104 : vector<16x128xf32>
    %106 = math.log %105 : vector<16x128xf32>
    %107 = arith.subf %103, %101 : vector<16x128xf32>
    %108 = arith.mulf %8, %107 : vector<16x128xf32>
    %109 = arith.subf %101, %106 : vector<16x128xf32>
    %110 = arith.mulf %5, %109 : vector<16x128xf32>
    %111 = arith.addf %108, %110 : vector<16x128xf32>
    %112 = arith.addf %100, %111 : vector<16x128xf32>
    %113 = arith.cmpf one, %112, %112 : vector<16x128xf32>
    %cst_31 = arith.constant 0x7F800000 : f32
    %114 = vector.broadcast %cst_31 : f32 to vector<16x128xf32>
    %115 = arith.select %113, %114, %112 : vector<16x128xi1>, vector<16x128xf32>
    %c0_32 = arith.constant 0 : index
    %c0_33 = arith.constant 0 : index
    %116 = vector.load %arg5[%c0_32, %c0_33] : memref<8x128xf32, #tpu.memory_space<vmem>>, vector<8x128xf32>
    %117 = vector.shape_cast %115 : vector<16x128xf32> to vector<2x8x128xf32>
    %cst_34 = arith.constant dense<0.000000e+00> : vector<8x128xf32>
    %118 = vector.multi_reduction <add>, %117, %cst_34 [0] : vector<2x8x128xf32> to vector<8x128xf32>
    %119 = arith.addf %116, %118 : vector<8x128xf32>
    %c0_35 = arith.constant 0 : index
    %c0_36 = arith.constant 0 : index
    %120 = vector.load %arg5[%c0_35, %c0_36] : memref<8x128xf32, #tpu.memory_space<vmem>>, vector<8x128xf32>
    tpu.vector_store %arg5[%c0_35, %c0_36], %119 {strides = array<i32>} : memref<8x128xf32, #tpu.memory_space<vmem>>, vector<8x128xf32>,
    %c0_i32_37 = arith.constant 0 : i32
    %121 = arith.cmpi eq, %arg1, %c0_i32_37 : i32
    %122 = arith.extui %121 : i1 to i32
    %c0_i32_38 = arith.constant 0 : i32
    %123 = arith.cmpi ne, %122, %c0_i32_38 : i32
    scf.if %123 {
      %c0_39 = arith.constant 0 : index
      %c0_40 = arith.constant 0 : index
      %124 = vector.load %arg5[%c0_39, %c0_40] : memref<8x128xf32, #tpu.memory_space<vmem>>, vector<8x128xf32>
      %125 = vector.shape_cast %124 : vector<8x128xf32> to vector<1x8x128xf32>
      %cst_41 = arith.constant dense<0.000000e+00> : vector<1xf32>
      %126 = vector.multi_reduction <add>, %125, %cst_41 [1, 2] : vector<1x8x128xf32> to vector<1xf32>
      %127 = vector.shape_cast %126 : vector<1xf32> to vector<1x1x1xf32>
      %128 = vector.extract %127[0, 0, 0] : f32 from vector<1x1x1xf32>
      %129 = vector.broadcast %128 : f32 to vector<1x8x128xf32>
      %c0_42 = arith.constant 0 : index
      %c0_43 = arith.constant 0 : index
      %c0_44 = arith.constant 0 : index
      %130 = vector.load %arg4[%c0_42, %c0_43, %c0_44] : memref<1x8x128xf32, #tpu.memory_space<vmem>>, vector<1x8x128xf32>
      tpu.vector_store %arg4[%c0_42, %c0_43, %c0_44], %129 {strides = array<i32>} : memref<1x8x128xf32, #tpu.memory_space<vmem>>, vector<1x8x128xf32>,
    } else {
    }
    return
  }
  func.func @transform_0(%arg0: i32, %arg1: i32) -> (i32, i32) {
    %c1_i32 = arith.constant 1 : i32
    %0 = arith.muli %arg0, %c1_i32 : i32
    %1 = arith.addi %0, %arg1 : i32
    %c0_i32 = arith.constant 0 : i32
    %2 = arith.minsi %1, %c0_i32 : i32
    %c0_i32_0 = arith.constant 0 : i32
    %c0_i32_1 = arith.constant 0 : i32
    return %2, %c0_i32_0 : i32, i32
  }
  func.func @transform_1(%arg0: i32, %arg1: i32) -> (i32, i32) {
    %c1_i32 = arith.constant 1 : i32
    %0 = arith.muli %arg0, %c1_i32 : i32
    %1 = arith.addi %0, %arg1 : i32
    %c0_i32 = arith.constant 0 : i32
    %2 = arith.minsi %1, %c0_i32 : i32
    %c0_i32_0 = arith.constant 0 : i32
    %c0_i32_1 = arith.constant 0 : i32
    return %2, %c0_i32_0 : i32, i32
  }
  func.func @transform_2(%arg0: i32, %arg1: i32) -> (i32, i32, i32) {
    %c0_i32 = arith.constant 0 : i32
    %c0_i32_0 = arith.constant 0 : i32
    %c0_i32_1 = arith.constant 0 : i32
    return %arg0, %c0_i32, %c0_i32_0 : i32, i32, i32
  }
}

</mosaic_0001>

<bundles_post_ra>
// kernel: tpu_custom_call.1
= control target key start
LH: loop header
LB: loop body
LE: loop exit
PB: predicated region body
PF: predicated region fallthrough
CT: control target
= control target key end

     0   :  { %7 = vsyncpa [#allocation4], 0  ;;  %s607_s0 = inlined_call_operand.hbm [shape: f32[16,256], index: 0, kind: input, shape index: {}]   ;;  %s608_s1 = inlined_call_operand.hbm [shape: f32[16,128], index: 1, kind: input, shape index: {}]   ;;  %s609_s2 = inlined_call_operand.hbm [shape: f32[1,8,128], index: 2, kind: output, shape index: {}]  }
   0x1   :  { %8 = vsyncpa [#allocation7], 0 }
   0x2   :  { %9 = vsyncpa [#allocation5], 0  ;;  %s446_s9 = smov [#allocation3]   ;;  %s374_s13 = scalar_lea.hbm %s607_s0, 512 }
   0x3   :  { %s22_s10 = sshll.u32 %s446_s9, 4  ;;  %p375_p0 = scmp.ne.s32.totalorder %s607_s0, %s374_s13  ;;  %s23_s10 = int_to_ptr.vmem [resolvable:$true] %s22_s10 }
   0x4   :  { %p378_p1 = scmp.lt.u32.totalorder %s374_s13, %s607_s0 }
   0x6   :  { %p380_p2 = pnand %p378_p1, %p375_p0 }
   0x8   :  { %383 = shalt.err (!%p380_p2)
}
   0x9   :  { %s384_s18 = scalar_lea.vmem %s23_s10, 512  ;;  %p389_p4 = scmp.lt.s32.totalorder %s23_s10, %s23_s10 }
   0xa   :  { %p385_p3 = scmp.ne.s32.totalorder %s23_s10, %s384_s18  ;;  %p390_p5 = scmp.lt.s32.totalorder %s384_s18, %s384_s18 }
   0xc   :  { %p391_p6 = por %p390_p5, %p389_p4 }
   0xe   :  { %p392_p7 = pnand %p391_p6, %p385_p3 }
  0x10   :  { %395 = shalt.err (!%p392_p7)
}
  0x11   :  { %s447_s19 = smov 256   ;;  %s448_s20 = smov 16  }
  0x12   :  { %28 = dma.hbm_to_vmem [thread:$0]  %s607_s0, 512, %s23_s10, [#allocation4], %s447_s19, %s447_s19, %s448_s20  }
  0x13   :  { %s449_s23 = smov [#allocation6]   ;;  %s396_s27 = scalar_lea.hbm %s608_s1, 256 }
  0x14   :  { %s40_s24 = sshll.u32 %s449_s23, 4  ;;  %p397_p8 = scmp.ne.s32.totalorder %s608_s1, %s396_s27  ;;  %s41_s24 = int_to_ptr.vmem [resolvable:$true] %s40_s24 }
  0x15   :  { %p400_p9 = scmp.lt.u32.totalorder %s396_s27, %s608_s1 }
  0x17   :  { %p402_p10 = pnand %p400_p9, %p397_p8 }
  0x19   :  { %405 = shalt.err (!%p402_p10)
}
  0x1a   :  { %s406_s4 = scalar_lea.vmem %s41_s24, 256  ;;  %p411_p12 = scmp.lt.s32.totalorder %s41_s24, %s41_s24 }
  0x1b   :  { %p407_p11 = scmp.ne.s32.totalorder %s41_s24, %s406_s4  ;;  %p412_p13 = scmp.lt.s32.totalorder %s406_s4, %s406_s4 }
  0x1d   :  { %p413_p0 = por %p412_p13, %p411_p12 }
  0x1f   :  { %p414_p1 = pnand %p413_p0, %p407_p11 }
  0x21   :  { %417 = shalt.err (!%p414_p1)
}
  0x22   :  { %s450_s0 = smov 128   ;;  %s451_s5 = smov 8  }
  0x23   :  { %46 = dma.hbm_to_vmem [thread:$0]  %s608_s1, 256, %s41_s24, [#allocation7], %s450_s0, %s450_s0, %s451_s5  }
  0x24   :  { %440 = dma.done.wait [#allocation4], 512  }
  0x25   :  { %441 = vsyncadd [#allocation4], 4294966784 }
  0x26   :  { %442 = dma.done.wait [#allocation7], 256  }
  0x27   :  { %443 = vsyncadd [#allocation7], 4294967040  ;;  %v492_v0 = vld [vmem:[#allocation3 + $0x8] sm:$0xff]  ;;  %v494_v1 = vld [vmem:[#allocation3 + $0x18] sm:$0xff]  ;;  %s452_s1 = smov [#allocation8]  }
  0x28   :  { %v496_v2 = vld [vmem:[#allocation6] sm:$0xff]  ;;  %v499_v3 = vadd.f32 1e-08, %v492_v0  ;;  %v501_v4 = vld [vmem:[#allocation6 + $0x8] sm:$0xff]  ;;  %v504_v5 = vadd.f32 1e-08, %v494_v1 }
  0x29   :  { %v78_v8 = vadd.f32 1.0, %v496_v2  ;;  %v79_v11 = vadd.f32 1.0, %v501_v4  ;;  %v557_v58 = vld [vmem:[#allocation3] sm:$0xff]  ;;  %s285_s8 = sshll.u32 %s452_s1, 4  ;;  %s286_s8 = int_to_ptr.vmem [resolvable:$true] %s285_s8 }
  0x2a   :  { %v507_v6 = vadd.f32 6.0, %v499_v3  ;;  %v106_v7 = vadd.f32 5.0, %v499_v3  ;;  %v512_v9 = vadd.f32 6.0, %v504_v5  ;;  %v107_v10 = vadd.f32 5.0, %v504_v5  ;;  %s418_s10 = scalar_lea.vmem %s286_s8, 128  ;;  %p423_p3 = scmp.lt.s32.totalorder %s286_s8, %s286_s8 }
  0x2b   :  { %v76_v13 = vadd.f32 %v499_v3, %v496_v2  ;;  %v77_v15 = vadd.f32 %v504_v5, %v501_v4  ;;  %v525_v19 = vadd.f32 6.0, %v78_v8  ;;  %v154_v20 = vadd.f32 5.0, %v78_v8  ;;  %p419_p2 = scmp.ne.s32.totalorder %s286_s8, %s418_s10  ;;  %p424_p4 = scmp.lt.s32.totalorder %s418_s10, %s418_s10 }
  0x2c   :  { %v108_v12 = vmul.f32 %v106_v7, %v499_v3  ;;  %314 = vrcp.f32 %v507_v6  ;;  %v109_v14 = vmul.f32 %v107_v10, %v504_v5  ;;  %v155_v23 = vadd.f32 5.0, %v79_v11 }
  0x2d   :  { %316 = vlog2.f32 %v507_v6  ;;  %v528_v24 = vadd.f32 6.0, %v79_v11  ;;  %v156_v25 = vmul.f32 %v154_v20, %v78_v8  ;;  %v204_v27 = vadd.f32 5.0, %v76_v13  ;;  %p425_p5 = por %p424_p4, %p423_p3 }
  0x2e   :  { %v110_v16 = vadd.f32 4.0, %v108_v12  ;;  %v118_v17 = vadd.f32 6.0, %v108_v12  ;;  %318 = vrcp.f32 %v512_v9  ;;  %v119_v18 = vadd.f32 6.0, %v109_v14 }
  0x2f   :  { %320 = vlog2.f32 %v512_v9  ;;  %v111_v21 = vadd.f32 4.0, %v109_v14  ;;  %v157_v26 = vmul.f32 %v155_v23, %v79_v11  ;;  %v158_v28 = vadd.f32 4.0, %v156_v25  ;;  %v563_v11 = vld [vmem:[#allocation3 + $0x10] sm:$0xff]  ;;  %p426_p6 = pnand %p425_p5, %p419_p2 }
  0x30   :  { %v112_v22 = vmul.f32 %v110_v16, %v108_v12  ;;  %322 = vlog2.f32 %v118_v17  ;;  %v205_v31 = vadd.f32 5.0, %v77_v15  ;;  %v206_v34 = vmul.f32 %v204_v27, %v76_v13 }
  0x31   :  { %324 = vlog2.f32 %v119_v18  ;;  %v113_v29 = vmul.f32 %v111_v21, %v109_v14  ;;  %v159_v30 = vadd.f32 4.0, %v157_v26  ;;  %v160_v32 = vmul.f32 %v158_v28, %v156_v25 }
  0x32   :  { %326 = vlog2.f32 %v112_v22  ;;  %v166_v36 = vadd.f32 6.0, %v156_v25  ;;  %v207_v37 = vmul.f32 %v205_v31, %v77_v15  ;;  %v536_v39 = vadd.f32 6.0, %v76_v13 }
  0x33   :  { %328 = vrcp.f32 %v525_v19  ;;  %v161_v33 = vmul.f32 %v159_v30, %v157_v26  ;;  %v540_v41 = vadd.f32 6.0, %v77_v15  ;;  %v208_v44 = vadd.f32 4.0, %v206_v34 }
  0x34   :  { %330 = vrcp.f32 %v528_v24  ;;  %v299_v46 = vadd.f32 -0.5, %v507_v6  ;;  %v209_v48 = vadd.f32 4.0, %v207_v37  ;;  %v300_v50 = vadd.f32 -0.5, %v512_v9 }
  0x35   :  { %332 = vlog2.f32 %v525_v19  ;;  %v167_v52 = vadd.f32 6.0, %v157_v26  ;;  %v301_v54 = vadd.f32 -0.5, %v525_v19  ;;  %v302_v55 = vadd.f32 -0.5, %v528_v24 }
  0x36   :  { %v533_v35 = vpop.eup %314  ;;  %334 = vlog2.f32 %v528_v24  ;;  %v553_v56 = vadd.f32 -0.5, %v536_v39  ;;  %v210_v61 = vmul.f32 %v208_v44, %v206_v34  ;;  %v211_v7 = vmul.f32 %v209_v48, %v207_v37 }
  0x37   :  { %v317_v38 = vpop.eup %316  ;;  %336 = vlog2.f32 %v113_v29  ;;  %v96_v43 = vmul.f32 %v533_v35, %v533_v35  ;;  %v216_v8 = vadd.f32 6.0, %v206_v34  ;;  %v304_v17 = vadd.f32 -0.5, %v540_v41 }
  0x38   :  { %v538_v40 = vpop.eup %318  ;;  %338 = vlog2.f32 %v160_v32  ;;  %v87_v47 = vmul.f32 0.6931472, %v317_v38  ;;  %v217_v18 = vadd.f32 6.0, %v207_v37  ;;  %v232_v20 = vadd.f32 %v499_v3, %v557_v58 }
  0x39   :  { %v321_v42 = vpop.eup %320  ;;  %340 = vlog2.f32 %v161_v33  ;;  %v97_v51 = vmul.f32 %v538_v40, %v538_v40  ;;  %v98_v60 = vmul.f32 0.0027777778, %v96_v43  ;;  %v233_v29 = vadd.f32 %v504_v5, %v563_v11 }
  0x3a   :  { %v323_v45 = vpop.eup %322  ;;  %342 = vlog2.f32 %v166_v36  ;;  %v89_v59 = vmul.f32 0.6931472, %v321_v42  ;;  %v90_v63 = vmul.f32 %v299_v46, %v87_v47 }
  0x3b   :  { %v325_v49 = vpop.eup %324  ;;  %344 = vrcp.f32 %v536_v39  ;;  %v99_v12 = vmul.f32 0.0027777778, %v97_v51  ;;  %v100_v23 = vsub.f32 0.083333336, %v98_v60  ;;  %v121_v28 = vmul.f32 0.6931472, %v323_v45 }
  0x3c   :  { %v327_v53 = vpop.eup %326  ;;  %346 = vrcp.f32 %v540_v41  ;;  %v91_v22 = vmul.f32 %v300_v50, %v89_v59  ;;  %v92_v27 = vsub.f32 %v90_v63, %v507_v6  ;;  %v123_v36 = vmul.f32 0.6931472, %v325_v49 }
  0x3d   :  { %v555_v57 = vpop.eup %328  ;;  %348 = vlog2.f32 %v536_v39  ;;  %v101_v31 = vsub.f32 0.083333336, %v99_v12  ;;  %v102_v6 = vmul.f32 %v533_v35, %v100_v23  ;;  %v115_v44 = vmul.f32 0.6931472, %v327_v53 }
  0x3e   :  { %v560_v62 = vpop.eup %330  ;;  %350 = vlog2.f32 %v540_v41  ;;  %v144_v13 = vmul.f32 %v555_v57, %v555_v57  ;;  %v93_v43 = vsub.f32 %v91_v22, %v512_v9  ;;  %v94_v46 = vadd.f32 0.9189385, %v92_v27 }
  0x3f   :  { %v333_v10 = vpop.eup %332  ;;  %v145_v14 = vmul.f32 %v560_v62, %v560_v62  ;;  %352 = vlog2.f32 %v167_v52  ;;  %v103_v59 = vmul.f32 %v538_v40, %v101_v31 }
  0x40   :  { %v335_v15 = vpop.eup %334  ;;  %v135_v16 = vmul.f32 0.6931472, %v333_v10  ;;  %354 = vlog2.f32 %v210_v61  ;;  %v146_v32 = vmul.f32 0.0027777778, %v144_v13 }
  0x41   :  { %v337_v21 = vpop.eup %336  ;;  %v137_v25 = vmul.f32 0.6931472, %v335_v15  ;;  %356 = vlog2.f32 %v211_v7  ;;  %v147_v33 = vmul.f32 0.0027777778, %v145_v14 }
  0x42   :  { %v339_v26 = vpop.eup %338  ;;  %358 = vlog2.f32 %v216_v8  ;;  %v138_v37 = vmul.f32 %v301_v54, %v135_v16  ;;  %v117_v47 = vmul.f32 0.6931472, %v337_v21  ;;  %v148_v51 = vsub.f32 0.083333336, %v146_v32 }
  0x43   :  { %v341_v30 = vpop.eup %340  ;;  %v139_v38 = vmul.f32 %v302_v55, %v137_v25  ;;  %360 = vlog2.f32 %v217_v18  ;;  %v149_v49 = vsub.f32 0.083333336, %v147_v33  ;;  %v163_v63 = vmul.f32 0.6931472, %v339_v26 }
  0x44   :  { %v343_v34 = vpop.eup %342  ;;  %362 = vlog2.f32 %v499_v3  ;;  %v140_v55 = vsub.f32 %v138_v37, %v525_v19  ;;  %v95_v3 = vadd.f32 0.9189385, %v93_v43  ;;  %v238_v8 = vadd.f32 1e-08, %v557_v58 }
  0x45   :  { %v345_v42 = vpop.eup %344  ;;  %364 = vlog2.f32 %v504_v5  ;;  %v141_v9 = vsub.f32 %v139_v38, %v528_v24  ;;  %v150_v12 = vmul.f32 %v555_v57, %v148_v51  ;;  %v165_v19 = vmul.f32 0.6931472, %v341_v30 }
  0x46   :  { %v347_v45 = vpop.eup %346  ;;  %v194_v48 = vmul.f32 %v345_v42, %v345_v42  ;;  %366 = vlog2.f32 %v232_v20  ;;  %v169_v13 = vmul.f32 0.6931472, %v343_v34  ;;  %v142_v15 = vadd.f32 0.9189385, %v140_v55 }
  0x47   :  { %v349_v50 = vpop.eup %348  ;;  %v195_v52 = vmul.f32 %v347_v45, %v347_v45  ;;  %368 = vlog2.f32 %v233_v29  ;;  %v143_v16 = vadd.f32 0.9189385, %v141_v9  ;;  %v151_v18 = vmul.f32 %v560_v62, %v149_v49 }
  0x48   :  { %v351_v54 = vpop.eup %350  ;;  %v185_v35 = vmul.f32 0.6931472, %v349_v50  ;;  %v196_v61 = vmul.f32 0.0027777778, %v194_v48  ;;  %v124_v58 = vadd.f32 %v121_v28, %v115_v44  ;;  %370 = vlog2.f32 %v238_v8 }
  0x49   :  { %v353_v53 = vpop.eup %352  ;;  %v187_v60 = vmul.f32 0.6931472, %v351_v54  ;;  %v197_v7 = vmul.f32 0.0027777778, %v195_v52  ;;  %v105_v27 = vadd.f32 %v103_v59, %v95_v3  ;;  %v125_v29 = vadd.f32 %v123_v36, %v117_v47 }
  0x4a   :  { %v188_v5 = vmul.f32 %v553_v56, %v185_v35  ;;  %v355_v10 = vpop.eup %354  ;;  %v171_v40 = vmul.f32 0.6931472, %v353_v53  ;;  %v198_v22 = vsub.f32 0.083333336, %v196_v61  ;;  %v239_v56 = vadd.f32 1e-08, %v563_v11 }
  0x4b   :  { %v189_v24 = vmul.f32 %v304_v17, %v187_v60  ;;  %v357_v14 = vpop.eup %356  ;;  %v199_v57 = vsub.f32 0.083333336, %v197_v7  ;;  %v104_v17 = vadd.f32 %v102_v6, %v94_v46  ;;  %v152_v62 = vadd.f32 %v150_v12, %v142_v15 }
  0x4c   :  { %v359_v20 = vpop.eup %358  ;;  %v190_v21 = vsub.f32 %v188_v5, %v536_v39  ;;  %372 = vlog2.f32 %v239_v56  ;;  %v153_v31 = vadd.f32 %v151_v18, %v143_v16  ;;  %v172_v32 = vadd.f32 %v169_v13, %v163_v63 }
  0x4d   :  { %v361_v23 = vpop.eup %360  ;;  %v191_v25 = vsub.f32 %v189_v24, %v540_v41  ;;  %v173_v33 = vadd.f32 %v171_v40, %v165_v19  ;;  %v200_v37 = vmul.f32 %v345_v42, %v198_v22  ;;  %v213_v11 = vmul.f32 0.6931472, %v355_v10 }
  0x4e   :  { %v363_v26 = vpop.eup %362  ;;  %v192_v34 = vadd.f32 0.9189385, %v190_v21  ;;  %v219_v38 = vmul.f32 0.6931472, %v359_v20  ;;  %v201_v41 = vmul.f32 %v347_v45, %v199_v57  ;;  %v215_v44 = vmul.f32 0.6931472, %v357_v14 }
  0x4f   :  { %v365_v30 = vpop.eup %364  ;;  %v193_v43 = vadd.f32 0.9189385, %v191_v25  ;;  %v221_v48 = vmul.f32 0.6931472, %v361_v23  ;;  %v229_v50 = vmul.f32 0.6931472, %v363_v26  ;;  %v126_v47 = vsub.f32 %v104_v17, %v124_v58 }
  0x50   :  { %v367_v39 = vpop.eup %366  ;;  %v231_v46 = vmul.f32 0.6931472, %v365_v30  ;;  %v174_v51 = vsub.f32 %v152_v62, %v172_v32  ;;  %v202_v49 = vadd.f32 %v200_v37, %v192_v34  ;;  %v222_v52 = vadd.f32 %v219_v38, %v213_v11 }
  0x51   :  { %v369_v28 = vpop.eup %368  ;;  %v235_v6 = vmul.f32 0.6931472, %v367_v39  ;;  %v127_v54 = vsub.f32 %v105_v27, %v125_v29  ;;  %v175_v55 = vsub.f32 %v153_v31, %v173_v33  ;;  %v203_v9 = vadd.f32 %v201_v41, %v193_v43 }
  0x52   :  { %v237_v36 = vmul.f32 0.6931472, %v369_v28  ;;  %v223_v35 = vadd.f32 %v221_v48, %v215_v44  ;;  %v74_v42 = vadd.f32 %v496_v2, %v492_v0  ;;  %v371_v3 = vpop.eup %370  ;;  %v75_v45 = vadd.f32 %v501_v4, %v494_v1 }
  0x53   :  { %v244_v53 = vsub.f32 %v235_v6, %v229_v50  ;;  %v176_v61 = vadd.f32 %v174_v51, %v126_v47  ;;  %v224_v63 = vsub.f32 %v202_v49, %v222_v52  ;;  %v241_v5 = vmul.f32 0.6931472, %v371_v3 }
  0x54   :  { %v245_v59 = vsub.f32 %v237_v36, %v231_v46  ;;  %v177_v7 = vadd.f32 %v175_v55, %v127_v54  ;;  %v225_v8 = vsub.f32 %v203_v9, %v223_v35 }
  0x55   :  { %v246_v12 = vmul.f32 %v244_v53, %v74_v42  ;;  %v248_v19 = vsub.f32 %v229_v50, %v241_v5  ;;  %v226_v14 = vsub.f32 %v176_v61, %v224_v63 }
  0x56   :  { %v373_v60 = vpop.eup %372  ;;  %v247_v13 = vmul.f32 %v245_v59, %v75_v45  ;;  %v227_v15 = vsub.f32 %v177_v7, %v225_v8 }
  0x57   :  { %v243_v10 = vmul.f32 0.6931472, %v373_v60  ;;  %v250_v0 = vmul.f32 %v248_v19, %v496_v2 }
  0x59   :  { %v249_v24 = vsub.f32 %v231_v46, %v243_v10  ;;  %v252_v18 = vadd.f32 %v250_v0, %v246_v12 }
  0x5b   :  { %v251_v16 = vmul.f32 %v249_v24, %v501_v4  ;;  %v254_v40 = vadd.f32 %v252_v18, %v226_v14 }
  0x5d   :  { %v253_v1 = vadd.f32 %v251_v16, %v247_v13  ;;  %vm256_vm0 = vcmp.ne.f32.partialorder %v254_v40, %v254_v40 }
  0x5e   :  { %v258_v21 = vsel %vm256_vm0, inf, %v254_v40 }
  0x5f   :  { %v255_v20 = vadd.f32 %v253_v1, %v227_v15 }
  0x61   :  { %vm257_vm1 = vcmp.ne.f32.partialorder %v255_v20, %v255_v20 }
  0x62   :  { %v259_v22 = vsel %vm257_vm1, inf, %v255_v20 }
  0x63   :  { %v261_v56 = vadd.f32 %v259_v22, %v258_v21 }
  0x65   :  { %268 = vadd.xlane.f32.xlu0 %v261_v56 }
  0xf2   :  { %v269_v23 = vpop.xlane.xlu0 %268 }
  0xf3   :  { %v270_v58 = vrot.slane %v269_v23, 4 }
  0xf5   :  { %v271_v25 = vadd.f32 %v270_v58, %v269_v23 }
  0xf7   :  { %v272_v57 = vrot.slane %v271_v25, 2 }
  0xf9   :  { %v273_v26 = vadd.f32 %v272_v57, %v271_v25 }
  0xfb   :  { %v274_v17 = vrot.slane %v273_v26, 1 }
  0xfd   :  { %v275_v2 = vadd.f32 %v274_v17, %v273_v26 }
  0xff   :  { %305 = vpush %v275_v2 }
 0x130   :  { %s306_s9 = spop %305 }
 0x131   :  { %v277_v4 = vstv %s306_s9 }
 0x132   :  { %278 = vst [vmem:[#allocation8] sm:$0xff] %v277_v4 }
 0x133   :  { %429 = shalt.err (!%p426_p6)
}
 0x134   :  { %s430_s13 = scalar_lea.hbm %s609_s2, 128 }
 0x135   :  { %p431_p7 = scmp.ne.s32.totalorder %s609_s2, %s430_s13  ;;  %p434_p8 = scmp.lt.u32.totalorder %s430_s13, %s609_s2 }
 0x137   :  { %p436_p9 = pnand %p434_p8, %p431_p7 }
 0x139   :  { %439 = shalt.err (!%p436_p9)
}
 0x13a   :  { %288 = dma.vmem_to_hbm [thread:$0]  %s286_s8, 128, %s609_s2, [#allocation5]  }
 0x13b   :  { %444 = dma.done.wait [#allocation5], 128  }
 0x13c   :  { %445 = vsyncadd [#allocation5], 4294967168 }
 0x13d   :  { %292 = vsyncpa [#allocation4], 1 }
 0x13e   :  { %293 = vsyncpa [#allocation7], 1 }
 0x13f   :  { %294 = vsyncpa [#allocation5], 1 }

</bundles_post_ra>
